<compile_context>
chip_gen: v5e
topology: v5e:2x2
jax: 0.10.0
libtpu: 0.0.40
codegen_flags: <defaults>
</compile_context>

<pallas_src>
import jax
import jax.numpy as jnp
from jax.experimental import pallas as pl
from jax.experimental.pallas import tpu as pltpu

CIN = 3
CIN_PAD = 8
EPS = 1e-5


def _encoder_kernel(x_ref,
                    w1_ref, t1_ref,
                    w2_ref, t2_ref,
                    w3_ref, t3_ref,
                    g_ref):
    """One (batch, point-tile) step: conv1/2/3 (BN folded into weights/shift),
    running max-pool into the resident output block."""
    n = pl.program_id(1)

    x = x_ref[0]                                                     # (Nt, 8) bf16

    # bf16 MXU operands, f32 accumulation; add-only (+relu) VPU epilogue
    # (BN scale already folded into the weight columns in the wrapper).
    h1 = jnp.dot(x, w1_ref[...], preferred_element_type=jnp.float32)
    h1 = jnp.maximum(h1 + t1_ref[...], 0.0)                          # (Nt, 64)

    h2 = jnp.dot(h1.astype(jnp.bfloat16), w2_ref[...],
                 preferred_element_type=jnp.float32)
    h2 = jnp.maximum(h2 + t2_ref[...], 0.0)                          # (Nt, 128)

    h3 = jnp.dot(h2.astype(jnp.bfloat16), w3_ref[...],
                 preferred_element_type=jnp.float32)
    h3 = h3 + t3_ref[...]                                            # (Nt, L)

    # Padded point rows (if any) are edge-mode duplicates of real points, so
    # they cannot affect the max -- no mask needed.
    tile_max = jnp.max(h3, axis=0, keepdims=True)                    # (1, L)

    # Running max-pool over point tiles: the output block index is invariant
    # along the (arbitrary) point-tile axis, so it stays resident in VMEM and
    # doubles as the accumulator.
    @pl.when(n == 0)
    def _():
        g_ref[0] = tile_max

    @pl.when(n > 0)
    def _():
        g_ref[0] = jnp.maximum(g_ref[0], tile_max)


def _head_layer_kernel(x_ref, w_ref, t_ref, o_ref):
    """One output-column tile of: relu((x @ w) + t)   (BN scale folded in w)."""
    f = jnp.dot(x_ref[...].astype(jnp.bfloat16), w_ref[...],
                preferred_element_type=jnp.float32)
    o_ref[...] = jnp.maximum(f + t_ref[...], 0.0)


def _linear_bn_relu(x, w_bf16, t, tn):
    """Batched (B, Lin) @ (Lin, Lout) + shift + relu, tiled over Lout."""
    B, Lin = x.shape
    Lout = w_bf16.shape[1]
    return pl.pallas_call(
        _head_layer_kernel,
        out_shape=jax.ShapeDtypeStruct((B, Lout), jnp.float32),
        grid=(Lout // tn,),
        in_specs=[pl.BlockSpec((B, Lin), lambda j: (0, 0)),
                  pl.BlockSpec((Lin, tn), lambda j: (0, j)),
                  pl.BlockSpec((1, tn), lambda j: (0, j))],
        out_specs=pl.BlockSpec((B, tn), lambda j: (0, j)),
        compiler_params=pltpu.CompilerParams(
            dimension_semantics=("parallel",)),
        cost_estimate=pl.CostEstimate(
            flops=int(2 * B * Lin * Lout), transcendentals=0,
            bytes_accessed=int(B * Lin * 4 + w_bf16.size * 2
                               + Lout * 4 + B * Lout * 4)),
    )(x, w_bf16, t)


def init_params(key, L):
    keys = iter(jax.random.split(key, 40))

    def nrm(shape, scale=0.1):
        return scale * jax.random.normal(next(keys), shape, dtype=jnp.float32)

    def bn(c):
        gamma = 1.0 + 0.1 * jax.random.normal(next(keys), (c,), dtype=jnp.float32)
        beta = nrm((c,))
        mean = nrm((c,))
        var = jax.random.uniform(next(keys), (c,), jnp.float32, 0.5, 1.5)
        return gamma, beta, mean, var

    p = {}
    p["conv1_w"] = nrm((64, CIN, 1));  p["conv1_b"] = nrm((64,))
    p["conv2_w"] = nrm((128, 64, 1));  p["conv2_b"] = nrm((128,))
    p["conv3_w"] = nrm((L, 128, 1));   p["conv3_b"] = nrm((L,))
    p["lin1_w"]  = nrm((L, L));        p["lin1_b"]  = nrm((L,))
    p["lin2_w"]  = nrm((L, L));        p["lin2_b"]  = nrm((L,))
    for i, c in zip(range(1, 6), (64, 128, L, L, L)):
        p[f"bn{i}"] = bn(c)
    return p


def fuse_affine(bias, bn_params):
    """Fold eval-mode BatchNorm1d + preceding bias into per-channel scale/shift."""
    gamma, beta, mean, var = bn_params
    s = gamma / jnp.sqrt(var + EPS)
    t = beta - mean * s + bias * s
    return s.reshape(1, -1), t.reshape(1, -1)


def pointnetfeat_forward(x, params, L, point_tile=2048, head_tile=512):
    B, C, N = x.shape
    assert C == CIN
    assert point_tile % 8 == 0 and L % 128 == 0
    head_tile = min(head_tile, L)
    assert L % head_tile == 0 and head_tile % 128 == 0

    n_tiles = pl.cdiv(N, point_tile)
    n_pad = n_tiles * point_tile

    # Points-major layout: points on sublanes, channels (3 -> 8 zero pad) on
    # lanes.  Pad the point axis with edge-mode copies of the last real point
    # (duplicates leave the global max untouched -> no in-kernel mask), then
    # zero-pad channels and cast to bf16 (halves x DMA bytes).
    # TODO(synk): an NCW-native layout (channels on sublanes, 16 packed points
    # per 128-lane register) would remove this wrapper transpose entirely.
    xp = jnp.transpose(x, (0, 2, 1))                                 # (B, N, 3)
    if n_pad > N:
        xp = jnp.pad(xp, ((0, 0), (0, n_pad - N), (0, 0)), mode="edge")
    xp = jnp.pad(xp, ((0, 0), (0, 0), (0, CIN_PAD - C))).astype(jnp.bfloat16)

    # Fold conv/linear bias + eval-mode BN into per-channel scale/shift, then
    # fold the scale into the weight columns -> add-only in-kernel epilogue.
    s1, t1 = fuse_affine(params["conv1_b"], params["bn1"])
    s2, t2 = fuse_affine(params["conv2_b"], params["bn2"])
    s3, t3 = fuse_affine(params["conv3_b"], params["bn3"])
    s4, t4 = fuse_affine(params["lin1_b"], params["bn4"])
    s5, t5 = fuse_affine(params["lin2_b"], params["bn5"])

    w1 = jnp.pad(params["conv1_w"][:, :, 0].T, ((0, CIN_PAD - C), (0, 0)))
    w1 = (w1 * s1).astype(jnp.bfloat16)                              # (8, 64)
    w2 = (params["conv2_w"][:, :, 0].T * s2).astype(jnp.bfloat16)    # (64, 128)
    w3 = (params["conv3_w"][:, :, 0].T * s3).astype(jnp.bfloat16)    # (128, L)

    enc_consts = [w1, t1, w2, t2, w3, t3]
    # Constant blocks have an invariant index map, so Pallas does not re-DMA
    # them across the grid.
    # TODO(synk): pipeline_mode=pl.Buffered(1) on these invariant specs would
    # save one buffer copy of w3 (~VMEM headroom on v7x); left at default.
    const_spec = lambda a: pl.BlockSpec(a.shape, lambda b, n: (0, 0))

    # Explicit scoped-VMEM limit with headroom: the larger default point_tile
    # (2048) needs > v5e's 16 MiB default scoped limit; 32 MiB covers the
    # ~11-12 MiB live set at L=1024 and stays well inside v7x's 64 MiB.
    est_vmem = (2 * point_tile * CIN_PAD * 2                     # x (dbl-buf, bf16)
                + point_tile * (64 + 128 + L) * 4                # h1/h2/h3 f32
                + 2 * sum(int(a.size) * a.dtype.itemsize for a in enc_consts)
                + 2 * L * 4)
    vmem_limit = int(min(60 << 20, max(32 << 20, est_vmem * 3 // 2)))

    flops_enc = int(2 * B * n_pad * (CIN_PAD * 64 + 64 * 128 + 128 * L))
    bytes_enc = int(xp.size * 2
                    + sum(int(a.size) * a.dtype.itemsize for a in enc_consts)
                    + B * L * 4)

    # TODO(synk): for B == 1 on v7x, add a leading size-2 core axis splitting
    # the point range (plus a final cross-half max) so both TensorCores work.
    g = pl.pallas_call(
        _encoder_kernel,
        out_shape=jax.ShapeDtypeStruct((B, 1, L), jnp.float32),
        grid=(B, n_tiles),
        in_specs=[pl.BlockSpec((1, point_tile, CIN_PAD), lambda b, n: (b, n, 0))]
                 + [const_spec(a) for a in enc_consts],
        out_specs=pl.BlockSpec((1, 1, L), lambda b, n: (b, 0, 0)),
        compiler_params=pltpu.CompilerParams(
            dimension_semantics=("parallel", "arbitrary"),
            vmem_limit_bytes=vmem_limit),
        cost_estimate=pl.CostEstimate(
            flops=flops_enc, transcendentals=0, bytes_accessed=bytes_enc),
    )(xp, *enc_consts)

    g = g[:, 0, :]                                                   # (B, L)

    # FC head: two batched (B, L) @ (L, tn) passes tiled over output columns,
    # bf16 weights (BN scale folded in), f32 accumulation + shift + relu.
    w4 = (params["lin1_w"].T * s4).astype(jnp.bfloat16)              # (L, L)
    w5 = (params["lin2_w"].T * s5).astype(jnp.bfloat16)              # (L, L)

    f1 = _linear_bn_relu(g, w4, t4, head_tile)
    out = _linear_bn_relu(f1, w5, t5, head_tile)
    return out


def ref_forward(x, p, L):
    """Pure-JAX f32 reference mirroring the PyTorch forward (eval-mode BN)."""
    def bn(z, prm):
        g, b, m, v = prm
        return (g[None, :, None] * (z - m[None, :, None]) /
                jnp.sqrt(v + EPS)[None, :, None] + b[None, :, None])

    h = jnp.einsum("oc,bcn->bon", p["conv1_w"][:, :, 0], x) + p["conv1_b"][None, :, None]
    h = jax.nn.relu(bn(h, p["bn1"]))
    h = jnp.einsum("oc,bcn->bon", p["conv2_w"][:, :, 0], h) + p["conv2_b"][None, :, None]
    h = jax.nn.relu(bn(h, p["bn2"]))
    h = jnp.einsum("oc,bcn->bon", p["conv3_w"][:, :, 0], h) + p["conv3_b"][None, :, None]
    h = bn(h, p["bn3"])
    g = jnp.max(h, axis=2)                                           # (B, L)
    f = g @ p["lin1_w"].T + p["lin1_b"]
    f = jax.nn.relu(bn(f[:, :, None], p["bn4"]))[:, :, 0]
    f = f @ p["lin2_w"].T + p["lin2_b"]
    f = jax.nn.relu(bn(f[:, :, None], p["bn5"]))[:, :, 0]
    return f


if __name__ == "__main__":
    # Small demo shapes: 3 point tiles of 128 (last one edge-padded) to
    # exercise the running max-pool, plus a column-tiled head (tn=128).
    B, N, L = 2, 320, 256
    key = jax.random.PRNGKey(0)
    kx, kp = jax.random.split(key)

    x = jax.random.normal(kx, (B, CIN, N), dtype=jnp.float32)
    params = init_params(kp, L)

    out = pointnetfeat_forward(x, params, L, point_tile=128, head_tile=128)
    out = jax.block_until_ready(out)

    ref = ref_forward(x, params, L)
    assert out.shape == (B, L), out.shape
    err = float(jnp.max(jnp.abs(out - ref)))
    # bf16 MXU operands (incl. BN-scale-folded weights) -> loose tolerance.
    assert jnp.allclose(out, ref, rtol=5e-2, atol=5e-2), err

    print("KERNEL_OK")
</pallas_src>

<mosaic_0001>
module attributes {stable_mosaic.version = 11 : i64} {
  func.func @_encoder_kernel(%arg0: i32, %arg1: i32, %arg2: memref<1x128x8xbf16, #tpu.memory_space<vmem>>, %arg3: memref<8x64xbf16, #tpu.memory_space<vmem>>, %arg4: memref<1x64xf32, #tpu.memory_space<vmem>>, %arg5: memref<64x128xbf16, #tpu.memory_space<vmem>>, %arg6: memref<1x128xf32, #tpu.memory_space<vmem>>, %arg7: memref<128x256xbf16, #tpu.memory_space<vmem>>, %arg8: memref<1x256xf32, #tpu.memory_space<vmem>>, %arg9: memref<1x1x256xf32, #tpu.memory_space<vmem>>) attributes {dimension_semantics = [#tpu.dimension_semantics<parallel>, #tpu.dimension_semantics<arbitrary>], iteration_bounds = array<i64: 2, 3>, scalar_prefetch = 0 : i64, scratch_operands = 0 : i64, tpu.core_type = #tpu.core_type<tc>, window_params = [{transform_indices = @transform_0, window_bounds = array<i64: 1, 128, 8>}, {pipeline_mode = #tpu.pipeline_mode<synchronous>, transform_indices = @transform_1, window_bounds = array<i64: 8, 64>}, {pipeline_mode = #tpu.pipeline_mode<synchronous>, transform_indices = @transform_2, window_bounds = array<i64: 1, 64>}, {pipeline_mode = #tpu.pipeline_mode<synchronous>, transform_indices = @transform_3, window_bounds = array<i64: 64, 128>}, {pipeline_mode = #tpu.pipeline_mode<synchronous>, transform_indices = @transform_4, window_bounds = array<i64: 1, 128>}, {pipeline_mode = #tpu.pipeline_mode<synchronous>, transform_indices = @transform_5, window_bounds = array<i64: 128, 256>}, {pipeline_mode = #tpu.pipeline_mode<synchronous>, transform_indices = @transform_6, window_bounds = array<i64: 1, 256>}, {transform_indices = @transform_7, window_bounds = array<i64: 1, 1, 256>}]} {
    %c0 = arith.constant 0 : index
    %c0_0 = arith.constant 0 : index
    %c0_1 = arith.constant 0 : index
    %0 = vector.load %arg2[%c0, %c0_0, %c0_1] : memref<1x128x8xbf16, #tpu.memory_space<vmem>>, vector<1x128x8xbf16>
    %1 = vector.shape_cast %0 : vector<1x128x8xbf16> to vector<128x8xbf16>
    %c0_2 = arith.constant 0 : index
    %c0_3 = arith.constant 0 : index
    %2 = vector.load %arg3[%c0_2, %c0_3] : memref<8x64xbf16, #tpu.memory_space<vmem>>, vector<8x64xbf16>
    %cst = arith.constant dense<0.000000e+00> : vector<128x64xf32>
    %3 = tpu.matmul %1, %2, %cst {dimension_numbers = #tpu.dot_dimension_numbers<[1], [0], [0], [1], [0, 0, 1, 1], [], []>} : vector<128x8xbf16>, vector<8x64xbf16>, vector<128x64xf32> -> vector<128x64xf32>
    %c0_4 = arith.constant 0 : index
    %c0_5 = arith.constant 0 : index
    %4 = vector.load %arg4[%c0_4, %c0_5] : memref<1x64xf32, #tpu.memory_space<vmem>>, vector<1x64xf32>
    %5 = vector.broadcast %4 : vector<1x64xf32> to vector<128x64xf32>
    %6 = arith.addf %3, %5 : vector<128x64xf32>
    %cst_6 = arith.constant 0.000000e+00 : f32
    %7 = vector.broadcast %cst_6 : f32 to vector<128x64xf32>
    %8 = arith.maximumf %6, %7 : vector<128x64xf32>
    %9 = arith.truncf %8 : vector<128x64xf32> to vector<128x64xbf16>
    %c0_7 = arith.constant 0 : index
    %c0_8 = arith.constant 0 : index
    %10 = vector.load %arg5[%c0_7, %c0_8] : memref<64x128xbf16, #tpu.memory_space<vmem>>, vector<64x128xbf16>
    %cst_9 = arith.constant dense<0.000000e+00> : vector<128x128xf32>
    %11 = tpu.matmul %9, %10, %cst_9 {dimension_numbers = #tpu.dot_dimension_numbers<[1], [0], [0], [1], [0, 0, 1, 1], [], []>} : vector<128x64xbf16>, vector<64x128xbf16>, vector<128x128xf32> -> vector<128x128xf32>
    %c0_10 = arith.constant 0 : index
    %c0_11 = arith.constant 0 : index
    %12 = vector.load %arg6[%c0_10, %c0_11] : memref<1x128xf32, #tpu.memory_space<vmem>>, vector<1x128xf32>
    %13 = vector.broadcast %12 : vector<1x128xf32> to vector<128x128xf32>
    %14 = arith.addf %11, %13 : vector<128x128xf32>
    %cst_12 = arith.constant 0.000000e+00 : f32
    %15 = vector.broadcast %cst_12 : f32 to vector<128x128xf32>
    %16 = arith.maximumf %14, %15 : vector<128x128xf32>
    %17 = arith.truncf %16 : vector<128x128xf32> to vector<128x128xbf16>
    %c0_13 = arith.constant 0 : index
    %c0_14 = arith.constant 0 : index
    %18 = vector.load %arg7[%c0_13, %c0_14] : memref<128x256xbf16, #tpu.memory_space<vmem>>, vector<128x256xbf16>
    %cst_15 = arith.constant dense<0.000000e+00> : vector<128x256xf32>
    %19 = tpu.matmul %17, %18, %cst_15 {dimension_numbers = #tpu.dot_dimension_numbers<[1], [0], [0], [1], [0, 0, 1, 1], [], []>} : vector<128x128xbf16>, vector<128x256xbf16>, vector<128x256xf32> -> vector<128x256xf32>
    %c0_16 = arith.constant 0 : index
    %c0_17 = arith.constant 0 : index
    %20 = vector.load %arg8[%c0_16, %c0_17] : memref<1x256xf32, #tpu.memory_space<vmem>>, vector<1x256xf32>
    %21 = vector.broadcast %20 : vector<1x256xf32> to vector<128x256xf32>
    %22 = arith.addf %19, %21 : vector<128x256xf32>
    %cst_18 = arith.constant dense<0xFF800000> : vector<256xf32>
    %23 = vector.multi_reduction <maximumf>, %22, %cst_18 [0] : vector<128x256xf32> to vector<256xf32>
    %24 = vector.shape_cast %23 : vector<256xf32> to vector<1x256xf32>
    %c0_i32 = arith.constant 0 : i32
    %25 = arith.cmpi eq, %arg1, %c0_i32 : i32
    %26 = arith.extui %25 : i1 to i32
    %c0_i32_19 = arith.constant 0 : i32
    %27 = arith.cmpi ne, %26, %c0_i32_19 : i32
    scf.if %27 {
      %c0_22 = arith.constant 0 : index
      %c0_23 = arith.constant 0 : index
      %c0_24 = arith.constant 0 : index
      %31 = vector.load %arg9[%c0_22, %c0_23, %c0_24] : memref<1x1x256xf32, #tpu.memory_space<vmem>>, vector<1x1x256xf32>
      %32 = vector.shape_cast %31 : vector<1x1x256xf32> to vector<1x256xf32>
      %33 = vector.shape_cast %24 : vector<1x256xf32> to vector<1x1x256xf32>
      tpu.vector_store %arg9[%c0_22, %c0_23, %c0_24], %33 {strides = array<i32>} : memref<1x1x256xf32, #tpu.memory_space<vmem>>, vector<1x1x256xf32>,
    } else {
    }
    %c0_i32_20 = arith.constant 0 : i32
    %28 = arith.cmpi sgt, %arg1, %c0_i32_20 : i32
    %29 = arith.extui %28 : i1 to i32
    %c0_i32_21 = arith.constant 0 : i32
    %30 = arith.cmpi ne, %29, %c0_i32_21 : i32
    scf.if %30 {
      %c0_22 = arith.constant 0 : index
      %c0_23 = arith.constant 0 : index
      %c0_24 = arith.constant 0 : index
      %31 = vector.load %arg9[%c0_22, %c0_23, %c0_24] : memref<1x1x256xf32, #tpu.memory_space<vmem>>, vector<1x1x256xf32>
      %32 = vector.shape_cast %31 : vector<1x1x256xf32> to vector<1x256xf32>
      %33 = arith.maximumf %32, %24 : vector<1x256xf32>
      %c0_25 = arith.constant 0 : index
      %c0_26 = arith.constant 0 : index
      %c0_27 = arith.constant 0 : index
      %34 = vector.load %arg9[%c0_25, %c0_26, %c0_27] : memref<1x1x256xf32, #tpu.memory_space<vmem>>, vector<1x1x256xf32>
      %35 = vector.shape_cast %34 : vector<1x1x256xf32> to vector<1x256xf32>
      %36 = vector.shape_cast %33 : vector<1x256xf32> to vector<1x1x256xf32>
      tpu.vector_store %arg9[%c0_25, %c0_26, %c0_27], %36 {strides = array<i32>} : memref<1x1x256xf32, #tpu.memory_space<vmem>>, vector<1x1x256xf32>,
    } else {
    }
    return
  }
  func.func @transform_0(%arg0: i32, %arg1: i32) -> (i32, i32, i32) {
    %c0_i32 = arith.constant 0 : i32
    %c0_i32_0 = arith.constant 0 : i32
    return %arg0, %arg1, %c0_i32 : i32, i32, i32
  }
  func.func @transform_1(%arg0: i32, %arg1: i32) -> (i32, i32) {
    %c0_i32 = arith.constant 0 : i32
    %c0_i32_0 = arith.constant 0 : i32
    %c0_i32_1 = arith.constant 0 : i32
    return %c0_i32, %c0_i32_0 : i32, i32
  }
  func.func @transform_2(%arg0: i32, %arg1: i32) -> (i32, i32) {
    %c0_i32 = arith.constant 0 : i32
    %c0_i32_0 = arith.constant 0 : i32
    %c0_i32_1 = arith.constant 0 : i32
    return %c0_i32, %c0_i32_0 : i32, i32
  }
  func.func @transform_3(%arg0: i32, %arg1: i32) -> (i32, i32) {
    %c0_i32 = arith.constant 0 : i32
    %c0_i32_0 = arith.constant 0 : i32
    %c0_i32_1 = arith.constant 0 : i32
    return %c0_i32, %c0_i32_0 : i32, i32
  }
  func.func @transform_4(%arg0: i32, %arg1: i32) -> (i32, i32) {
    %c0_i32 = arith.constant 0 : i32
    %c0_i32_0 = arith.constant 0 : i32
    %c0_i32_1 = arith.constant 0 : i32
    return %c0_i32, %c0_i32_0 : i32, i32
  }
  func.func @transform_5(%arg0: i32, %arg1: i32) -> (i32, i32) {
    %c0_i32 = arith.constant 0 : i32
    %c0_i32_0 = arith.constant 0 : i32
    %c0_i32_1 = arith.constant 0 : i32
    return %c0_i32, %c0_i32_0 : i32, i32
  }
  func.func @transform_6(%arg0: i32, %arg1: i32) -> (i32, i32) {
    %c0_i32 = arith.constant 0 : i32
    %c0_i32_0 = arith.constant 0 : i32
    %c0_i32_1 = arith.constant 0 : i32
    return %c0_i32, %c0_i32_0 : i32, i32
  }
  func.func @transform_7(%arg0: i32, %arg1: i32) -> (i32, i32, i32) {
    %c0_i32 = arith.constant 0 : i32
    %c0_i32_0 = arith.constant 0 : i32
    %c0_i32_1 = arith.constant 0 : i32
    return %arg0, %c0_i32, %c0_i32_0 : i32, i32, i32
  }
}

</mosaic_0001>

<bundles_post_ra>
// kernel: tpu_custom_call.1
= control target key start
LH: loop header
LB: loop body
LE: loop exit
PB: predicated region body
PF: predicated region fallthrough
CT: control target
= control target key end

     0   :  { %s1684_s0 = inlined_call_operand.vmem [shape: bf16[2,384,8], index: 0, kind: input, shape index: {}]   ;;  %s1685_s1 = inlined_call_operand.vmem [shape: bf16[8,64], index: 1, kind: input, shape index: {}]   ;;  %s1686_s2 = inlined_call_operand.vmem [shape: f32[1,64], index: 2, kind: input, shape index: {}]   ;;  %s1687_s3 = inlined_call_operand.vmem [shape: bf16[64,128], index: 3, kind: input, shape index: {}]   ;;  %s1688_s4 = inlined_call_operand.vmem [shape: f32[1,128], index: 4, kind: input, shape index: {}]   ;;  %s1689_s5 = inlined_call_operand.vmem [shape: bf16[128,256], index: 5, kind: input, shape index: {}]   ;;  %s1690_s6 = inlined_call_operand.vmem [shape: f32[1,256], index: 6, kind: input, shape index: {}]   ;;  %s1691_s7 = inlined_call_operand.hbm [shape: f32[2,1,256], index: 7, kind: output, shape index: {}]  }
   0x1   :  { %1693 = sst [smem:[#allocation7_spill]] %s1684_s0 }
   0x2   :  { %12 = vsyncpa [#allocation3], 0 }
   0x3   :  { %14 = vsyncpa [#allocation3 + $0x1], 0  ;;  %s1349_s24 = smov 0   ;;  %s1351_s25 = smov 0  }
   0x4   :  { %s1353_s26 = smov 0   ;;  %s1355_s27 = smov 0  }
   0x5   :  { %s1357_s28 = smov 0   ;;  %s1359_s29 = smov 0  }
   0x6   :  { %s1361_s30 = smov 0   ;;  %s1363_s8 = smov 0  }
   0x7 LB: > { %s969_s9 = sadd.s32 4294967295, %s1307_s8   ;;  %s970_s10 = sadd.s32 4294967294, %s1307_s8   ;;  %s1307_s8 = sphi %s1363_s8, %s20_s8   ;;  %s1303_s30 = sphi %s1361_s30, %s1707_s30   ;;  %s1299_s29 = sphi %s1359_s29, %s1706_s29   ;;  %s1295_s28 = sphi %s1357_s28, %s1705_s28   ;;  %s1291_s27 = sphi %s1355_s27, %s1704_s27   ;;  %s1287_s26 = sphi %s1353_s26, %s1703_s26   ;;  %s1283_s25 = sphi %s1351_s25, %s1702_s25   ;;  %s1279_s24 = sphi %s1349_s24, %s1701_s24  }
   0x8   : > { %s29_s11 = sadd.s32 1, %s1299_s29  ;;  %s32_s12 = sadd.s32 1, %s1303_s30 }
   0x9   : > { %p30_p0 = scmp.ge.s32.totalorder %s29_s11, 3  ;;  %p203_p1 = scmp.ne.s32.totalorder %s1287_s26, %s1283_s25 }
   0xa   : > { %p204_p2 = scmp.eq.s32.totalorder %s969_s9, 5  ;;  %p209_p4 = scmp.ne.s32.totalorder %s1283_s25, %s1279_s24 }
   0xb   : > { %s1709_s11 = smov (%p30_p0, %s29_s11), 0  ;;  %s1711_s12 = smov (!%p30_p0, %s32_s12), %s1303_s30 }
   0xc   : > { %1694 = sst [smem:[#allocation5_spill]] %s1709_s11  ;;  %p1398_p3 = por %p204_p2, %p203_p1 }
   0xd   : > { %p34_p5 = scmp.ge.s32.totalorder %s1711_s12, 2  ;;  %p210_p6 = scmp.eq.s32.totalorder %s970_s10, 5 }
   0xe   : > { %p973_p7 = scmp.ge.s32.totalorder %s1307_s8, 1  ;;  %p259_p8 = scmp.lt.s32.totalorder %s1307_s8, 7 }
   0xf   : > { %s1713_s12 = smov (%p34_p5, %s1711_s12), 0  ;;  %p1408_p9 = por %p210_p6, %p209_p4 }
  0x10   : > { %1696 = sst [smem:[#allocation6_spill]] %s1713_s12  ;;  %p260_p10 = pnand %p973_p7, %p259_p8 }
  0x11   : > { %s190_s15 = ssub.s32 %s1303_s30, %s1713_s12  ;;  %s193_s16 = sadd.s32 1, %s1287_s26 }
  0x12   : > { %p191_p11 = scmp.eq.s32.totalorder %s190_s15, 0  ;;  %263 = sbr.rel (%p260_p10) target bundleno = 613 (0x265), region = 48 }
  0x13   : > { %s292_s18 = sand.u32 (!%p260_p10), 1, %s1283_s25   ;;  %s975_s21 = sshll.u32 (!%p260_p10), %s1291_s27, 4 }
  0x14   : > { %s1416_s17 = scalar_select %p191_p11, %s1287_s26, %s193_s16  }
  0x15   : > { %s1425_s22 = sshll.u32 (!%p260_p10), %s292_s18, 1  ;;  %p296_p12 = scmp.lt.s32.totalorder (!%p260_p10), %s1295_s28, 1 }
  0x16   : > { %p298_p13 = scmp.lt.s32.totalorder (!%p260_p10), %s975_s21, 47  ;;  %s1698_s0 = sld [smem:[#allocation7_spill]] (!%p260_p10) }
  0x17   : > { %v322_v0 = vld [vmem:[%s1685_s1] sm:$0xf]  ;;  %vm392_vm0 = vcmask 1043456   ;;  %s297_s23 = scalar_select %p296_p12, %s1295_s28, 1  ;;  %vm367_vm1 = vcmask 64512   ;;  %v1122_v8 = vld [vmem:[%s1687_s3 + $0x18] sm:$0xff] }
  0x18   : > { %v394_v1 = vsel %vm392_vm0, %v322_v0, 0  ;;  %s1715_s21 = smov (!%p298_p13, %s975_s21), 47  ;;  %534 = vmatpush.bf16.msra.mxu1 %v1122_v8  ;;  %v1121_v10 = vld [vmem:[%s1687_s3 + $0x10] sm:$0xff]  ;;  %v1120_v11 = vld [vmem:[%s1687_s3 + $0x8] sm:$0xff]  ;;  %v1119_v12 = vld [vmem:[%s1687_s3] sm:$0xff]  ;;  %vm505_vm2 = vcmask 523264  }
  0x19   : > { %403 = vmatpush.bf16.msra.mxu0 %v394_v1  ;;  %s1139_s9 = smul.u32 48, %s297_s23  ;;  %v1455_v15 = vld [vmem:[%s1686_s2] ss:$0 sm:$0xff]  ;;  %v1099_v54 = vld [vmem:[%s1689_s5 + $0x70] sm:$0xf]  ;;  %s294_s16 = scalar_lea.vmem [#allocation2], %s1425_s22 }
  0x1a   : > { %v1138_v55 = vld [vmem:[%s1689_s5 + $0x74] sm:$0xf0]  ;;  %v1137_v56 = vld [vmem:[%s1689_s5 + $0x74] sm:$0xf]  ;;  %v1101_v58 = vld [vmem:[%s1689_s5 + $0x78] sm:$0xf0] }
  0x1b   : > { %s301_s10 = sadd.s32 %s1139_s9, %s1715_s21  ;;  %v1100_v57 = vor.u32 %v1138_v55, %v1099_v54  ;;  %v1104_v61 = vor.u32 %v1137_v56, %v1101_v58  ;;  %v1091_v63 = vld [vmem:[%s1689_s5 + $0x60] sm:$0xf]  ;;  %v1136_v0 = vld [vmem:[%s1689_s5 + $0x64] sm:$0xf0]  ;;  %v1135_v1 = vld [vmem:[%s1689_s5 + $0x64] sm:$0xf] }
  0x1c   : > { %s976_s15 = sshll.u32 %s301_s10, 2  ;;  %535 = vmatpush.bf16.msra.mxu1 %v1121_v10  ;;  %v1085_v10 = vld [vmem:[%s1689_s5 + $0x58] sm:$0xf0]  ;;  %p1105_p0 = scmp.ne.s32.totalorder %s1291_s27, 0 }
  0x1d   : > { %s303_s11 = scalar_lea.vmem %s1698_s0, %s976_s15  ;;  %705 = vmatpush.bf16.msra.mxu2 %v1100_v57  ;;  %754 = vmatpush.bf16.msra.mxu3 %v1104_v61  ;;  %v1580_v57 = vld [vmem:[%s1688_s4] ss:$0 sm:$0xff] }
  0x1e   : > { %v1111_v2 = vld [vmem:[%s303_s11] sm:$0xff]  ;;  %v1112_v3 = vld [vmem:[%s303_s11 + $0x8] sm:$0xff]  ;;  %v1113_v4 = vld [vmem:[%s303_s11 + $0x10] sm:$0xff] }
  0x1f   : > { %1009 = vmatmul.msk.bf16.vlgmr.msra.gmra.mxu0 %vm367_vm1, %v1111_v2  ;;  %v1114_v5 = vld [vmem:[%s303_s11 + $0x18] sm:$0xff]  ;;  %v1115_v6 = vld [vmem:[%s303_s11 + $0x20] sm:$0xff]  ;;  %v1116_v7 = vld [vmem:[%s303_s11 + $0x28] sm:$0xff]  ;;  %v1092_v2 = vor.u32 %v1136_v0, %v1091_v63 }
  0x20   : > { %v1117_v9 = vld [vmem:[%s303_s11 + $0x30] sm:$0xff]  ;;  %536 = vmatpush.bf16.msra.mxu1 %v1120_v11  ;;  %v1118_v13 = vld [vmem:[%s303_s11 + $0x38] sm:$0xff] }
  0x21   : > { %706 = vmatpush.bf16.msra.mxu2 %v1092_v2 }
  0x24   : > { %537 = vmatpush.bf16.msra.mxu1 %v1119_v12  ;;  %v1075_v12 = vld [vmem:[%s1689_s5 + $0x40] sm:$0xf] }
  0x2f   : > { %1010 = vmatmul.msk.bf16.gmra.mxu0 %vm367_vm1, %v1112_v3  ;;  %v1093_v3 = vld [vmem:[%s1689_s5 + $0x68] sm:$0xf0] }
  0x3f   : > { %1011 = vmatmul.msk.bf16.gmra.mxu0 %vm367_vm1, %v1113_v4  ;;  %v1096_v4 = vor.u32 %v1135_v1, %v1093_v3 }
  0x41   : > { %755 = vmatpush.bf16.msra.mxu3 %v1096_v4 }
  0x4f   : > { %1012 = vmatmul.msk.bf16.gmra.mxu0 %vm367_vm1, %v1114_v5  ;;  %v1083_v5 = vld [vmem:[%s1689_s5 + $0x50] sm:$0xf] }
  0x5f   : > { %1013 = vmatmul.msk.bf16.gmra.mxu0 %vm367_vm1, %v1115_v6  ;;  %v1134_v6 = vld [vmem:[%s1689_s5 + $0x54] sm:$0xf0] }
  0x6f   : > { %1014 = vmatmul.msk.bf16.gmra.mxu0 %vm367_vm1, %v1116_v7  ;;  %v1133_v7 = vld [vmem:[%s1689_s5 + $0x54] sm:$0xf] }
  0x70   : > { %v1088_v11 = vor.u32 %v1133_v7, %v1085_v10 }
  0x72   : > { %756 = vmatpush.bf16.msra.mxu3 %v1088_v11 }
  0x7f   : > { %1015 = vmatmul.msk.bf16.gmra.mxu0 %vm367_vm1, %v1117_v9  ;;  %v1084_v9 = vor.u32 %v1134_v6, %v1083_v5 }
  0x81   : > { %707 = vmatpush.bf16.msra.mxu2 %v1084_v9 }
  0x8f   : > { %1016 = vmatmul.msk.bf16.gmra.mxu0 %vm367_vm1, %v1118_v13  ;;  %v1132_v13 = vld [vmem:[%s1689_s5 + $0x44] sm:$0xf0] }
  0x9c   : > { %v405_v14 = vpop.f32.mrf.mxu0 }
  0x9d   : > { %v406_v16 = vadd.f32 %v1455_v15, %v405_v14  ;;  %v1131_v14 = vld [vmem:[%s1689_s5 + $0x44] sm:$0xf] }
  0x9f   : > { %v445_v19 = vmax.f32 %v406_v16, 0.0  ;;  %v1077_v16 = vld [vmem:[%s1689_s5 + $0x48] sm:$0xf0] }
  0xa4   : > { %v407_v17 = vpop.f32.mrf.mxu0 }
  0xa5   : > { %v408_v18 = vadd.f32 %v1455_v15, %v407_v17  ;;  %v1076_v17 = vor.u32 %v1132_v13, %v1075_v12 }
  0xa7   : > { %v446_v20 = vmax.f32 %v408_v18, 0.0  ;;  %v1080_v18 = vor.u32 %v1131_v14, %v1077_v16  ;;  %708 = vmatpush.bf16.msra.mxu2 %v1076_v17 }
  0xa9   : > { %v461_v21 = vpack.c.bf16 %v446_v20, %v445_v19  ;;  %757 = vmatpush.bf16.msra.mxu3 %v1080_v18 }
  0xab   : > { %1033 = vmatmul.msk.bf16.vlgmr.msra.gmra.mxu1 %vm505_vm2, %v461_v21 }
  0xac   : > { %v410_v22 = vpop.f32.mrf.mxu0 }
  0xad   : > { %v411_v23 = vadd.f32 %v1455_v15, %v410_v22  ;;  %v1067_v22 = vld [vmem:[%s1689_s5 + $0x30] sm:$0xf] }
  0xaf   : > { %v447_v26 = vmax.f32 %v411_v23, 0.0  ;;  %v1130_v23 = vld [vmem:[%s1689_s5 + $0x34] sm:$0xf0] }
  0xb4   : > { %v412_v24 = vpop.f32.mrf.mxu0 }
  0xb5   : > { %v413_v25 = vadd.f32 %v1455_v15, %v412_v24  ;;  %v1129_v24 = vld [vmem:[%s1689_s5 + $0x34] sm:$0xf] }
  0xb7   : > { %v448_v27 = vmax.f32 %v413_v25, 0.0  ;;  %v1068_v25 = vor.u32 %v1130_v23, %v1067_v22 }
  0xb9   : > { %v462_v28 = vpack.c.bf16 %v448_v27, %v447_v26  ;;  %v1069_v26 = vld [vmem:[%s1689_s5 + $0x38] sm:$0xf0]  ;;  %709 = vmatpush.bf16.msra.mxu2 %v1068_v25 }
  0xbb   : > { %1034 = vmatmul.msk.bf16.gmra.mxu1 %vm505_vm2, %v462_v28 }
  0xbc   : > { %v415_v29 = vpop.f32.mrf.mxu0 }
  0xbd   : > { %v416_v30 = vadd.f32 %v1455_v15, %v415_v29  ;;  %v1072_v29 = vor.u32 %v1129_v24, %v1069_v26 }
  0xbf   : > { %v449_v33 = vmax.f32 %v416_v30, 0.0  ;;  %758 = vmatpush.bf16.msra.mxu3 %v1072_v29 }
  0xc4   : > { %v417_v31 = vpop.f32.mrf.mxu0 }
  0xc5   : > { %v418_v32 = vadd.f32 %v1455_v15, %v417_v31  ;;  %v1059_v31 = vld [vmem:[%s1689_s5 + $0x20] sm:$0xf] }
  0xc7   : > { %v450_v34 = vmax.f32 %v418_v32, 0.0  ;;  %v1128_v32 = vld [vmem:[%s1689_s5 + $0x24] sm:$0xf0] }
  0xc9   : > { %v463_v35 = vpack.c.bf16 %v450_v34, %v449_v33  ;;  %v1127_v33 = vld [vmem:[%s1689_s5 + $0x24] sm:$0xf]  ;;  %v1060_v34 = vor.u32 %v1128_v32, %v1059_v31 }
  0xcb   : > { %1035 = vmatmul.msk.bf16.gmra.mxu1 %vm505_vm2, %v463_v35  ;;  %v1061_v35 = vld [vmem:[%s1689_s5 + $0x28] sm:$0xf0]  ;;  %710 = vmatpush.bf16.msra.mxu2 %v1060_v34 }
  0xcc   : > { %v420_v36 = vpop.f32.mrf.mxu0 }
  0xcd   : > { %v421_v37 = vadd.f32 %v1455_v15, %v420_v36  ;;  %v1064_v36 = vor.u32 %v1127_v33, %v1061_v35 }
  0xcf   : > { %v451_v40 = vmax.f32 %v421_v37, 0.0  ;;  %759 = vmatpush.bf16.msra.mxu3 %v1064_v36 }
  0xd4   : > { %v422_v38 = vpop.f32.mrf.mxu0 }
  0xd5   : > { %v423_v39 = vadd.f32 %v1455_v15, %v422_v38  ;;  %v1051_v38 = vld [vmem:[%s1689_s5 + $0x10] sm:$0xf] }
  0xd7   : > { %v452_v41 = vmax.f32 %v423_v39, 0.0  ;;  %v1126_v39 = vld [vmem:[%s1689_s5 + $0x14] sm:$0xf0] }
  0xd9   : > { %v464_v42 = vpack.c.bf16 %v452_v41, %v451_v40  ;;  %v1125_v40 = vld [vmem:[%s1689_s5 + $0x14] sm:$0xf]  ;;  %v1052_v41 = vor.u32 %v1126_v39, %v1051_v38 }
  0xdb   : > { %1036 = vmatmul.msk.bf16.gmra.mxu1 %vm505_vm2, %v464_v42  ;;  %v1053_v42 = vld [vmem:[%s1689_s5 + $0x18] sm:$0xf0]  ;;  %711 = vmatpush.bf16.msra.mxu2 %v1052_v41 }
  0xdc   : > { %v425_v43 = vpop.f32.mrf.mxu0 }
  0xdd   : > { %v426_v44 = vadd.f32 %v1455_v15, %v425_v43  ;;  %v1056_v43 = vor.u32 %v1125_v40, %v1053_v42 }
  0xdf   : > { %v453_v47 = vmax.f32 %v426_v44, 0.0  ;;  %760 = vmatpush.bf16.msra.mxu3 %v1056_v43  ;;  %v1043_v44 = vld [vmem:[%s1689_s5] sm:$0xf] }
  0xe4   : > { %v427_v45 = vpop.f32.mrf.mxu0 }
  0xe5   : > { %v428_v46 = vadd.f32 %v1455_v15, %v427_v45  ;;  %v1124_v45 = vld [vmem:[%s1689_s5 + $0x4] sm:$0xf0] }
  0xe7   : > { %v454_v48 = vmax.f32 %v428_v46, 0.0  ;;  %v1123_v46 = vld [vmem:[%s1689_s5 + $0x4] sm:$0xf] }
  0xe9   : > { %v465_v49 = vpack.c.bf16 %v454_v48, %v453_v47  ;;  %v1044_v47 = vor.u32 %v1124_v45, %v1043_v44  ;;  %v1045_v48 = vld [vmem:[%s1689_s5 + $0x8] sm:$0xf0] }
  0xeb   : > { %1037 = vmatmul.msk.bf16.gmra.mxu1 %vm505_vm2, %v465_v49  ;;  %712 = vmatpush.bf16.msra.mxu2 %v1044_v47 }
  0xec   : > { %v430_v50 = vpop.f32.mrf.mxu0 }
  0xed   : > { %v431_v51 = vadd.f32 %v1455_v15, %v430_v50  ;;  %v1048_v50 = vor.u32 %v1123_v46, %v1045_v48 }
  0xef   : > { %v455_v59 = vmax.f32 %v431_v51, 0.0  ;;  %761 = vmatpush.bf16.msra.mxu3 %v1048_v50 }
  0xf4   : > { %v432_v52 = vpop.f32.mrf.mxu0 }
  0xf5   : > { %v433_v53 = vadd.f32 %v1455_v15, %v432_v52 }
  0xf7   : > { %v456_v60 = vmax.f32 %v433_v53, 0.0 }
  0xf9   : > { %v466_v62 = vpack.c.bf16 %v456_v60, %v455_v59 }
  0xfb   : > { %1038 = vmatmul.msk.bf16.gmra.mxu1 %vm505_vm2, %v466_v62 }
  0xfc   : > { %v435_v8 = vpop.f32.mrf.mxu0 }
  0xfd   : > { %v436_v19 = vadd.f32 %v1455_v15, %v435_v8 }
  0xff   : > { %v457_v27 = vmax.f32 %v436_v19, 0.0 }
 0x104   : > { %v437_v20 = vpop.f32.mrf.mxu0 }
 0x105   : > { %v438_v21 = vadd.f32 %v1455_v15, %v437_v20 }
 0x107   : > { %v458_v28 = vmax.f32 %v438_v21, 0.0 }
 0x109   : > { %v467_v30 = vpack.c.bf16 %v458_v28, %v457_v27 }
 0x10b   : > { %1039 = vmatmul.msk.bf16.gmra.mxu1 %vm505_vm2, %v467_v30 }
 0x10c   : > { %v440_v37 = vpop.f32.mrf.mxu0 }
 0x10d   : > { %v441_v49 = vadd.f32 %v1455_v15, %v440_v37 }
 0x10f   : > { %v459_v53 = vmax.f32 %v441_v49, 0.0 }
 0x114   : > { %v442_v51 = vpop.f32.mrf.mxu0 }
 0x115   : > { %v443_v52 = vadd.f32 %v1455_v15, %v442_v51 }
 0x117   : > { %v460_v54 = vmax.f32 %v443_v52, 0.0 }
 0x119   : > { %v468_v55 = vpack.c.bf16 %v460_v54, %v459_v53  ;;  %v619_v53 = vld [vmem:[%s1690_s6] sm:$0x3] }
 0x11a   : > { %v1601_v54 = vperm.slane %v619_v53, 0 }
 0x11b   : > { %1040 = vmatmul.msk.bf16.gmra.mxu1 %vm505_vm2, %v468_v55  ;;  %v1603_v55 = vperm.slane %v619_v53, 1 }
 0x128   : > { %v539_v56 = vpop.f32.mrf.mxu1 }
 0x129   : > { %v540_v58 = vadd.f32 %v1580_v57, %v539_v56 }
 0x12b   : > { %v579_v61 = vmax.f32 %v540_v58, 0.0 }
 0x130   : > { %v541_v59 = vpop.f32.mrf.mxu1 }
 0x131   : > { %v542_v60 = vadd.f32 %v1580_v57, %v541_v59 }
 0x133   : > { %v580_v62 = vmax.f32 %v542_v60, 0.0 }
 0x135   : > { %v595_v15 = vpack.c.bf16 %v580_v62, %v579_v61 }
 0x137   : > { %713 = vmatmul.bf16.vlgmr.msra.gmra.mxu2 %v595_v15  ;;  %762 = vmatmul.bf16.vlgmr.msra.gmra.mxu3 %v595_v15 }
 0x138   : > { %v544_v63 = vpop.f32.mrf.mxu1 }
 0x139   : > { %v545_v0 = vadd.f32 %v1580_v57, %v544_v63 }
 0x13b   : > { %v581_v3 = vmax.f32 %v545_v0, 0.0 }
 0x140   : > { %v546_v1 = vpop.f32.mrf.mxu1 }
 0x141   : > { %v547_v2 = vadd.f32 %v1580_v57, %v546_v1 }
 0x143   : > { %v582_v4 = vmax.f32 %v547_v2, 0.0 }
 0x145   : > { %v596_v5 = vpack.c.bf16 %v582_v4, %v581_v3 }
 0x147   : > { %718 = vmatmul.bf16.gmra.mxu2 %v596_v5  ;;  %767 = vmatmul.bf16.gmra.mxu3 %v596_v5 }
 0x148   : > { %v549_v6 = vpop.f32.mrf.mxu1 }
 0x149   : > { %v550_v7 = vadd.f32 %v1580_v57, %v549_v6 }
 0x14b   : > { %v583_v10 = vmax.f32 %v550_v7, 0.0 }
 0x150   : > { %v551_v8 = vpop.f32.mrf.mxu1 }
 0x151   : > { %v552_v9 = vadd.f32 %v1580_v57, %v551_v8 }
 0x153   : > { %v584_v11 = vmax.f32 %v552_v9, 0.0 }
 0x155   : > { %v597_v12 = vpack.c.bf16 %v584_v11, %v583_v10 }
 0x157   : > { %723 = vmatmul.bf16.gmra.mxu2 %v597_v12  ;;  %772 = vmatmul.bf16.gmra.mxu3 %v597_v12 }
 0x158   : > { %v554_v13 = vpop.f32.mrf.mxu1 }
 0x159   : > { %v555_v14 = vadd.f32 %v1580_v57, %v554_v13 }
 0x15b   : > { %v585_v18 = vmax.f32 %v555_v14, 0.0 }
 0x160   : > { %v556_v16 = vpop.f32.mrf.mxu1 }
 0x161   : > { %v557_v17 = vadd.f32 %v1580_v57, %v556_v16 }
 0x163   : > { %v586_v19 = vmax.f32 %v557_v17, 0.0 }
 0x165   : > { %v598_v20 = vpack.c.bf16 %v586_v19, %v585_v18 }
 0x167   : > { %728 = vmatmul.bf16.gmra.mxu2 %v598_v20  ;;  %777 = vmatmul.bf16.gmra.mxu3 %v598_v20 }
 0x168   : > { %v559_v21 = vpop.f32.mrf.mxu1 }
 0x169   : > { %v560_v22 = vadd.f32 %v1580_v57, %v559_v21 }
 0x16b   : > { %v587_v25 = vmax.f32 %v560_v22, 0.0 }
 0x170   : > { %v561_v23 = vpop.f32.mrf.mxu1 }
 0x171   : > { %v562_v24 = vadd.f32 %v1580_v57, %v561_v23 }
 0x173   : > { %v588_v26 = vmax.f32 %v562_v24, 0.0 }
 0x175   : > { %v599_v27 = vpack.c.bf16 %v588_v26, %v587_v25 }
 0x177   : > { %733 = vmatmul.bf16.gmra.mxu2 %v599_v27  ;;  %782 = vmatmul.bf16.gmra.mxu3 %v599_v27 }
 0x178   : > { %v564_v28 = vpop.f32.mrf.mxu1 }
 0x179   : > { %v565_v29 = vadd.f32 %v1580_v57, %v564_v28 }
 0x17b   : > { %v589_v32 = vmax.f32 %v565_v29, 0.0 }
 0x180   : > { %v566_v30 = vpop.f32.mrf.mxu1 }
 0x181   : > { %v567_v31 = vadd.f32 %v1580_v57, %v566_v30 }
 0x183   : > { %v590_v33 = vmax.f32 %v567_v31, 0.0 }
 0x185   : > { %v600_v34 = vpack.c.bf16 %v590_v33, %v589_v32 }
 0x187   : > { %738 = vmatmul.bf16.gmra.mxu2 %v600_v34  ;;  %787 = vmatmul.bf16.gmra.mxu3 %v600_v34 }
 0x188   : > { %v569_v35 = vpop.f32.mrf.mxu1 }
 0x189   : > { %v570_v36 = vadd.f32 %v1580_v57, %v569_v35 }
 0x18b   : > { %v591_v39 = vmax.f32 %v570_v36, 0.0 }
 0x190   : > { %v571_v37 = vpop.f32.mrf.mxu1 }
 0x191   : > { %v572_v38 = vadd.f32 %v1580_v57, %v571_v37 }
 0x193   : > { %v592_v40 = vmax.f32 %v572_v38, 0.0 }
 0x195   : > { %v601_v41 = vpack.c.bf16 %v592_v40, %v591_v39 }
 0x197   : > { %743 = vmatmul.bf16.gmra.mxu2 %v601_v41  ;;  %792 = vmatmul.bf16.gmra.mxu3 %v601_v41 }
 0x198   : > { %v574_v42 = vpop.f32.mrf.mxu1 }
 0x199   : > { %v575_v43 = vadd.f32 %v1580_v57, %v574_v42 }
 0x19b   : > { %v593_v46 = vmax.f32 %v575_v43, 0.0 }
 0x1a0   : > { %v576_v44 = vpop.f32.mrf.mxu1 }
 0x1a1   : > { %v577_v45 = vadd.f32 %v1580_v57, %v576_v44 }
 0x1a3   : > { %v594_v47 = vmax.f32 %v577_v45, 0.0 }
 0x1a5   : > { %v602_v48 = vpack.c.bf16 %v594_v47, %v593_v46 }
 0x1a7   : > { %748 = vmatmul.bf16.gmra.mxu2 %v602_v48  ;;  %797 = vmatmul.bf16.gmra.mxu3 %v602_v48 }
 0x1ba   : > { %v714_v49 = vpop.f32.mrf.mxu2  ;;  %v763_v50 = vpop.f32.mrf.mxu3 }
 0x1bb   : > { %v715_v57 = vadd.f32 %v714_v49, %v1601_v54  ;;  %v764_v59 = vadd.f32 %v763_v50, %v1603_v55 }
 0x1c2   : > { %v716_v51 = vpop.f32.mrf.mxu2  ;;  %v765_v52 = vpop.f32.mrf.mxu3 }
 0x1c3   : > { %v717_v1 = vadd.f32 %v716_v51, %v1601_v54  ;;  %v766_v2 = vadd.f32 %v765_v52, %v1603_v55 }
 0x1ca   : > { %v719_v56 = vpop.f32.mrf.mxu2  ;;  %v768_v58 = vpop.f32.mrf.mxu3 }
 0x1cb   : > { %v720_v60 = vadd.f32 %v719_v56, %v1601_v54  ;;  %v769_v61 = vadd.f32 %v768_v58, %v1603_v55 }
 0x1cd   : > { %v803_v62 = vmax.f32 %v715_v57, %v720_v60  ;;  %v824_v15 = vmax.f32 %v764_v59, %v769_v61 }
 0x1d2   : > { %v721_v63 = vpop.f32.mrf.mxu2  ;;  %v770_v0 = vpop.f32.mrf.mxu3 }
 0x1d3   : > { %v722_v3 = vadd.f32 %v721_v63, %v1601_v54  ;;  %v771_v4 = vadd.f32 %v770_v0, %v1603_v55 }
 0x1d5   : > { %v804_v5 = vmax.f32 %v717_v1, %v722_v3  ;;  %v825_v6 = vmax.f32 %v766_v2, %v771_v4 }
 0x1da   : > { %v724_v7 = vpop.f32.mrf.mxu2  ;;  %v773_v8 = vpop.f32.mrf.mxu3 }
 0x1db   : > { %v725_v9 = vadd.f32 %v724_v7, %v1601_v54  ;;  %v774_v10 = vadd.f32 %v773_v8, %v1603_v55 }
 0x1dd   : > { %v805_v11 = vmax.f32 %v803_v62, %v725_v9  ;;  %v826_v12 = vmax.f32 %v824_v15, %v774_v10 }
 0x1e2   : > { %v726_v13 = vpop.f32.mrf.mxu2  ;;  %v775_v14 = vpop.f32.mrf.mxu3 }
 0x1e3   : > { %v727_v16 = vadd.f32 %v726_v13, %v1601_v54  ;;  %v776_v17 = vadd.f32 %v775_v14, %v1603_v55 }
 0x1e5   : > { %v806_v18 = vmax.f32 %v804_v5, %v727_v16  ;;  %v827_v19 = vmax.f32 %v825_v6, %v776_v17 }
 0x1ea   : > { %v729_v20 = vpop.f32.mrf.mxu2  ;;  %v778_v21 = vpop.f32.mrf.mxu3 }
 0x1eb   : > { %v730_v22 = vadd.f32 %v729_v20, %v1601_v54  ;;  %v779_v23 = vadd.f32 %v778_v21, %v1603_v55 }
 0x1ed   : > { %v807_v24 = vmax.f32 %v805_v11, %v730_v22  ;;  %v828_v25 = vmax.f32 %v826_v12, %v779_v23 }
 0x1f2   : > { %v731_v26 = vpop.f32.mrf.mxu2  ;;  %v780_v27 = vpop.f32.mrf.mxu3 }
 0x1f3   : > { %v732_v40 = vadd.f32 %v731_v26, %v1601_v54  ;;  %v781_v41 = vadd.f32 %v780_v27, %v1603_v55 }
 0x1f5   : > { %v808_v50 = vmax.f32 %v806_v18, %v732_v40  ;;  %v829_v51 = vmax.f32 %v827_v19, %v781_v41 }
 0x1fa   : > { %v734_v28 = vpop.f32.mrf.mxu2  ;;  %v783_v29 = vpop.f32.mrf.mxu3 }
 0x1fb   : > { %v735_v42 = vadd.f32 %v734_v28, %v1601_v54  ;;  %v784_v43 = vadd.f32 %v783_v29, %v1603_v55 }
 0x1fd   : > { %v809_v56 = vmax.f32 %v807_v24, %v735_v42  ;;  %v830_v58 = vmax.f32 %v828_v25, %v784_v43 }
 0x202   : > { %v736_v30 = vpop.f32.mrf.mxu2  ;;  %v785_v31 = vpop.f32.mrf.mxu3 }
 0x203   : > { %v737_v46 = vadd.f32 %v736_v30, %v1601_v54  ;;  %v786_v47 = vadd.f32 %v785_v31, %v1603_v55 }
 0x205   : > { %v810_v60 = vmax.f32 %v808_v50, %v737_v46  ;;  %v831_v61 = vmax.f32 %v829_v51, %v786_v47 }
 0x20a   : > { %v739_v32 = vpop.f32.mrf.mxu2  ;;  %v788_v33 = vpop.f32.mrf.mxu3 }
 0x20b   : > { %v740_v48 = vadd.f32 %v739_v32, %v1601_v54  ;;  %v789_v49 = vadd.f32 %v788_v33, %v1603_v55 }
 0x20d   : > { %v811_v63 = vmax.f32 %v809_v56, %v740_v48  ;;  %v832_v0 = vmax.f32 %v830_v58, %v789_v49 }
 0x212   : > { %v741_v34 = vpop.f32.mrf.mxu2  ;;  %v790_v35 = vpop.f32.mrf.mxu3 }
 0x213   : > { %v742_v52 = vadd.f32 %v741_v34, %v1601_v54  ;;  %v791_v53 = vadd.f32 %v790_v35, %v1603_v55 }
 0x215   : > { %v812_v1 = vmax.f32 %v810_v60, %v742_v52  ;;  %v833_v2 = vmax.f32 %v831_v61, %v791_v53 }
 0x21a   : > { %v744_v36 = vpop.f32.mrf.mxu2  ;;  %v793_v37 = vpop.f32.mrf.mxu3 }
 0x21b   : > { %v745_v57 = vadd.f32 %v744_v36, %v1601_v54  ;;  %v794_v59 = vadd.f32 %v793_v37, %v1603_v55 }
 0x21d   : > { %v813_v5 = vmax.f32 %v811_v63, %v745_v57  ;;  %v834_v6 = vmax.f32 %v832_v0, %v794_v59 }
 0x222   : > { %v746_v38 = vpop.f32.mrf.mxu2  ;;  %v795_v39 = vpop.f32.mrf.mxu3 }
 0x223   : > { %v747_v62 = vadd.f32 %v746_v38, %v1601_v54  ;;  %v796_v15 = vadd.f32 %v795_v39, %v1603_v55 }
 0x225   : > { %v814_v9 = vmax.f32 %v812_v1, %v747_v62  ;;  %v835_v10 = vmax.f32 %v833_v2, %v796_v15 }
 0x22a   : > { %v749_v44 = vpop.f32.mrf.mxu2  ;;  %v798_v45 = vpop.f32.mrf.mxu3 }
 0x22b   : > { %v750_v3 = vadd.f32 %v749_v44, %v1601_v54  ;;  %v799_v4 = vadd.f32 %v798_v45, %v1603_v55 }
 0x22d   : > { %v815_v13 = vmax.f32 %v813_v5, %v750_v3  ;;  %v836_v14 = vmax.f32 %v834_v6, %v799_v4 }
 0x232   : > { %v751_v7 = vpop.f32.mrf.mxu2  ;;  %v800_v8 = vpop.f32.mrf.mxu3 }
 0x233   : > { %v752_v11 = vadd.f32 %v751_v7, %v1601_v54  ;;  %v801_v12 = vadd.f32 %v800_v8, %v1603_v55 }
 0x235   : > { %v816_v16 = vmax.f32 %v814_v9, %v752_v11  ;;  %v837_v17 = vmax.f32 %v835_v10, %v801_v12 }
 0x237   : > { %v817_v18 = vmax.f32 %v815_v13, %v816_v16  ;;  %v838_v19 = vmax.f32 %v836_v14, %v837_v17 }
 0x239   : > { %v818_v20 = vrot.slane %v817_v18, 4  ;;  %v839_v21 = vrot.slane %v838_v19, 4 }
 0x23b   : > { %v819_v22 = vmax.f32 %v817_v18, %v818_v20  ;;  %v840_v23 = vmax.f32 %v838_v19, %v839_v21 }
 0x23d   : > { %v820_v24 = vrot.slane %v819_v22, 2  ;;  %v841_v25 = vrot.slane %v840_v23, 2 }
 0x23f   : > { %v821_v26 = vmax.f32 %v819_v22, %v820_v24  ;;  %v842_v27 = vmax.f32 %v840_v23, %v841_v25  ;;  %848 = sbr.rel (%p1105_p0) target bundleno = 585 (0x249), region = 52 }
 0x241   : > { %v822_v28 = vrot.slane %v821_v26, 1  ;;  %v843_v29 = vrot.slane %v842_v27, 1 }
 0x243   : > { %v823_v54 = vmax.f32 %v821_v26, %v822_v28  ;;  %v844_v30 = vmax.f32 %v842_v27, %v843_v29 }
 0x244   : > { %vm852_vm3 = vcmask 1040384   ;;  %v855_v31 = vlaneseq }
 0x245   : > { %v851_v55 = vrot.slane %v844_v30, 7 }
 0x246   : > { %vm857_vm4 = vcmp.lt.s32.totalorder %v855_v31, 256 }
 0x247   : > { %v853_v32 = vsel %vm852_vm3, %v823_v54, %v851_v55 }
 0x248   : > { %859 = vst.msk [vmem:[%s294_s16] sm:$0x3] %vm857_vm4, %v853_v32 }
 0x249 PF: > { %p1106_p1 = scmp.le.s32.totalorder %s1291_s27, 0 }
 0x24b   : > { %863 = sbr.rel (%p1106_p1) target bundleno = 598 (0x256), region = 56 }
 0x250   : > { %v864_v33 = vld [vmem:[%s294_s16] sm:$0x3]  ;;  %v867_v34 = vrot.slane %v844_v30, 7  ;;  %vm868_vm5 = vcmask 1040384   ;;  %v872_v35 = vlaneseq }
 0x252   : > { %v869_v36 = vsel %vm868_vm5, %v823_v54, %v867_v34  ;;  %vm874_vm6 = vcmp.lt.s32.totalorder %v872_v35, 256 }
 0x253   : > { %v871_v37 = vmax.f32 %v864_v33, %v869_v36 }
 0x255   : > { %876 = vst.msk [vmem:[%s294_s16] sm:$0x3] %vm874_vm6, %v871_v37 }
 0x256 PF: > { %s1108_s22 = sshll.u32 %s1295_s28, 1  ;;  %s890_s20 = sshll.u32 %s294_s16, 4  ;;  %s891_s20 = int_to_ptr.vmem [resolvable:$true] %s890_s20 }
 0x257   : > { %s888_s19 = scalar_lea.hbm %s1691_s7, %s1108_s22  ;;  %s878_s21 = scalar_lea.sflag [#allocation3], %s292_s18 }
 0x258   : > { %s892_s27 = sshll.u32 %s888_s19, 4  ;;  %s1233_s28 = scalar_lea.hbm %s1691_s7, 4  ;;  %s893_s27 = int_to_ptr.hbm [resolvable:$true] %s892_s27 }
 0x259   : > { %s1227_s23 = sshra.s32 %s893_s27, 4  ;;  %s1228_s23 = int_to_ptr.hbm [resolvable:$true] %s1227_s23 }
 0x25a   : > { %s1229_s9 = scalar_lea.hbm %s1228_s23, 2  ;;  %p1234_p6 = scmp.lt.s32.totalorder %s1228_s23, %s1691_s7 }
 0x25b   : > { %p1230_p2 = scmp.ne.s32.totalorder %s1228_s23, %s1229_s9  ;;  %p1235_p7 = scmp.lt.s32.totalorder %s1233_s28, %s1229_s9 }
 0x25d   : > { %p1231_p4 = pnand %p1230_p2, %p1398_p3  ;;  %p1236_p8 = por %p1235_p7, %p1234_p6 }
 0x25f   : > { %p1232_p5 = pneg %p1231_p4 }
 0x261   : > { %p1237_p10 = pnand %p1236_p8, %p1232_p5 }
 0x263   : > { %1240 = shalt.err (!%p1237_p10)
}
 0x264   : > { %1140 = dma.vmem_to_hbm [thread:$0]  (%p1398_p3), %s891_s20, 32, %s893_s27, %s878_s21  }
 0x265 PF: > { %p1146_p11 = scmp.ge.s32.totalorder %s1307_s8, 2  ;;  %s904_s18 = sand.u32 1, %s1279_s24  }
 0x266   : > { %s905_s16 = scalar_lea.sflag [#allocation3], %s904_s18 }
 0x267   : > { %p1143_p12 = pnand %p1146_p11, %p1408_p9 }
 0x269   : > { %p1144_p13 = pneg %p1143_p12 }
 0x26b   : > { %1274 = dma.done.wait (%p1144_p13), %s905_s16, 32  }
 0x26c   : > { %1276 = vsyncadd (%p1144_p13), %s905_s16, 4294967264  ;;  %s20_s8 = sadd.s32 1, %s1307_s8   ;;  %s1699_s0 = sld [smem:[#allocation5_spill]] }
 0x26d   : > { %p17_p0 = scmp.ge.s32.totalorder %s20_s8, 8   ;;  %s1700_s13 = sld [smem:[#allocation6_spill]] }
 0x26e   : > { %s1701_s24 = smov %s1283_s25  ;;  %s1702_s25 = smov %s1287_s26 }
 0x26f   : > { %s1703_s26 = smov %s1416_s17  ;;  %s1704_s27 = smov %s1299_s29 }
 0x270   : > { %s1705_s28 = smov %s1303_s30  ;;  %19 = sbr.rel (!%p17_p0) target bundleno = 7 (0x7), region = 91 }
 0x272   : > { %s1706_s29 = smov %s1699_s0 }
 0x273   : > { %s1707_s30 = smov %s1700_s13 }
 0x275   :  { %911 = vsyncpa [#allocation3], 1 }
 0x276   :  { %913 = vsyncpa [#allocation3 + $0x1], 1 }

</bundles_post_ra>
